<compile_context>
chip_gen: v5e
topology: v5e:2x2
jax: 0.10.0
libtpu: 0.0.40
codegen_flags: <defaults>
</compile_context>

<pallas_src>
import jax
import jax.numpy as jnp
from jax.experimental import pallas as pl
from jax.experimental.pallas import tpu as pltpu


def class_embed_kernel(idx_ref, emb_hbm, out_ref, row_buf, sem):
    """Gather rows of an HBM embedding table into one dense output tile.

    idx_ref : SMEM (B,) int32        -- scalar-prefetched class ids
    emb_hbm : ANY/HBM (n_classes, D) -- full table, never copied wholesale
    out_ref : VMEM (B_TILE, D)       -- output tile for this grid step
    row_buf : VMEM (B_TILE, D)       -- DMA landing buffer for gathered rows
    sem     : DMA semaphore (shared; every row copy is the same size)
    """
    t = pl.program_id(0)
    b_tile = out_ref.shape[0]
    total_b = idx_ref.shape[0]
    n_classes = emb_hbm.shape[0]

    # Issue all per-row HBM->VMEM DMAs, then wait for all, then one dense
    # store. Waiting on a shared semaphore is safe because all copies move
    # the same number of bytes.
    copies = []
    for b in range(b_tile):
        row = jnp.minimum(t * b_tile + b, total_b - 1)   # clamp padded rows
        cls = jnp.clip(idx_ref[row], 0, n_classes - 1)   # clamp bad ids
        cp = pltpu.make_async_copy(emb_hbm.at[cls], row_buf.at[b], sem)
        cp.start()
        copies.append(cp)
    for cp in copies:
        cp.wait()

    out_ref[...] = row_buf[...]   # single lane-dense, unmasked tile store


def _round_up(x, m):
    return ((x + m - 1) // m) * m


def class_embedder_forward(c, emb_table, add_sequence_dim=False, b_tile=None):
    """Pallas implementation of ClassEmbedder.forward (embedding lookup)."""
    # For tiny, unfused lookups plain `jnp.take(emb_table, c, axis=0)` is just
    # as fast; this kernel pays off at large B / when fused with other work.
    B = c.shape[0]
    n_classes, D = emb_table.shape

    itemsize = jnp.dtype(emb_table.dtype).itemsize
    sublane = max(8, 32 // max(1, itemsize))      # 8 for f32, 16 for bf16
    if b_tile is None:
        b_tile = min(128, _round_up(B, sublane))  # one step for small B
    else:
        b_tile = _round_up(b_tile, sublane)

    grid = (pl.cdiv(B, b_tile),)

    out = pl.pallas_call(
        class_embed_kernel,
        out_shape=jax.ShapeDtypeStruct((B, D), emb_table.dtype),
        grid_spec=pltpu.PrefetchScalarGridSpec(
            num_scalar_prefetch=1,                    # class ids land in SMEM
            grid=grid,
            in_specs=[
                pl.BlockSpec(memory_space=pl.ANY),    # table stays in HBM
            ],
            out_specs=pl.BlockSpec((b_tile, D), lambda t, idx: (t, 0)),
            scratch_shapes=[
                pltpu.VMEM((b_tile, D), emb_table.dtype),
                pltpu.SemaphoreType.DMA,
            ],
        ),
        compiler_params=pltpu.CompilerParams(
            dimension_semantics=("parallel",),        # independent steps
        ),
    )(c.astype(jnp.int32), emb_table)

    if add_sequence_dim:
        out = out[:, None, :]   # glue: c[:, None, :]
    return out


if __name__ == "__main__":
    key = jax.random.PRNGKey(0)
    k_emb, k_idx = jax.random.split(key)

    N_CLASSES = 64
    EMBED_DIM = 128       # lane-dense last dim
    B = 6                 # deliberately not a multiple of 8: ragged last tile

    # nn.Embedding(n_classes, embed_dim) default init ~ N(0, 1)
    emb_table = jax.random.normal(k_emb, (N_CLASSES, EMBED_DIM), dtype=jnp.float32)
    c = jax.random.randint(k_idx, (B,), 0, N_CLASSES, dtype=jnp.int32)

    out = class_embedder_forward(c, emb_table, add_sequence_dim=False)
    out = jax.block_until_ready(out)

    out_seq = class_embedder_forward(c, emb_table, add_sequence_dim=True)
    out_seq = jax.block_until_ready(out_seq)

    # Reference check against plain JAX gather (== torch nn.Embedding lookup).
    ref = jnp.take(emb_table, c, axis=0)
    assert out.shape == (B, EMBED_DIM)
    assert out_seq.shape == (B, 1, EMBED_DIM)
    assert jnp.allclose(out, ref), "mismatch vs reference embedding lookup"
    assert jnp.allclose(out_seq[:, 0, :], ref)

    print("KERNEL_OK")
</pallas_src>

<mosaic_0001>
module attributes {stable_mosaic.version = 11 : i64} {
  func.func @class_embed_kernel(%arg0: i32, %arg1: memref<6xi32, #tpu.memory_space<smem>>, %arg2: memref<64x128xf32, #tpu.memory_space<any>>, %arg3: memref<8x128xf32, #tpu.memory_space<vmem>>, %arg4: memref<8x128xf32, #tpu.memory_space<vmem>>, %arg5: memref<!tpu.dma_semaphore, #tpu.memory_space<semaphore_mem>>) attributes {dimension_semantics = [#tpu.dimension_semantics<parallel>], iteration_bounds = array<i64: 1>, scalar_prefetch = 1 : i64, scratch_operands = 2 : i64, tpu.core_type = #tpu.core_type<tc>, window_params = [{}, {transform_indices = @transform_1, window_bounds = array<i64: 8, 128>}]} {
    %c8_i32 = arith.constant 8 : i32
    %0 = arith.muli %arg0, %c8_i32 : i32
    %c0_i32 = arith.constant 0 : i32
    %1 = arith.addi %0, %c0_i32 : i32
    %c5_i32 = arith.constant 5 : i32
    %2 = arith.minsi %1, %c5_i32 : i32
    %3 = arith.index_cast %2 : i32 to index
    %4 = memref.load %arg1[%3] : memref<6xi32, #tpu.memory_space<smem>>
    %c0_i32_0 = arith.constant 0 : i32
    %c63_i32 = arith.constant 63 : i32
    %5 = arith.maxsi %c0_i32_0, %4 : i32
    %6 = arith.minsi %c63_i32, %5 : i32
    %c0_i32_1 = arith.constant 0 : i32
    %c0_i32_2 = arith.constant 0 : i32
    %7 = tpu.memref_slice %arg2[%6, %c0_i32_2] : memref<64x128xf32, #tpu.memory_space<any>> -> memref<1x128xf32, #tpu.memory_space<any>>
    %8 = tpu.memref_squeeze %7 : memref<1x128xf32, #tpu.memory_space<any>> -> memref<128xf32, #tpu.memory_space<any>>
    %c0_i32_3 = arith.constant 0 : i32
    %9 = tpu.memref_slice %arg4[%c0_i32_1, %c0_i32_3] : memref<8x128xf32, #tpu.memory_space<vmem>> -> memref<1x128xf32, #tpu.memory_space<vmem>>
    %10 = tpu.memref_squeeze %9 : memref<1x128xf32, #tpu.memory_space<vmem>> -> memref<128xf32, #tpu.memory_space<vmem>>
    tpu.enqueue_dma source(%8 : memref<128xf32, #tpu.memory_space<any>>) target(%10 : memref<128xf32, #tpu.memory_space<vmem>>) target_semaphore(%arg5 : memref<!tpu.dma_semaphore, #tpu.memory_space<semaphore_mem>>)
    %c8_i32_4 = arith.constant 8 : i32
    %11 = arith.muli %arg0, %c8_i32_4 : i32
    %c1_i32 = arith.constant 1 : i32
    %12 = arith.addi %11, %c1_i32 : i32
    %c5_i32_5 = arith.constant 5 : i32
    %13 = arith.minsi %12, %c5_i32_5 : i32
    %14 = arith.index_cast %13 : i32 to index
    %15 = memref.load %arg1[%14] : memref<6xi32, #tpu.memory_space<smem>>
    %c0_i32_6 = arith.constant 0 : i32
    %c63_i32_7 = arith.constant 63 : i32
    %16 = arith.maxsi %c0_i32_6, %15 : i32
    %17 = arith.minsi %c63_i32_7, %16 : i32
    %c1_i32_8 = arith.constant 1 : i32
    %c0_i32_9 = arith.constant 0 : i32
    %18 = tpu.memref_slice %arg2[%17, %c0_i32_9] : memref<64x128xf32, #tpu.memory_space<any>> -> memref<1x128xf32, #tpu.memory_space<any>>
    %19 = tpu.memref_squeeze %18 : memref<1x128xf32, #tpu.memory_space<any>> -> memref<128xf32, #tpu.memory_space<any>>
    %c0_i32_10 = arith.constant 0 : i32
    %20 = tpu.memref_slice %arg4[%c1_i32_8, %c0_i32_10] : memref<8x128xf32, #tpu.memory_space<vmem>> -> memref<1x128xf32, #tpu.memory_space<vmem>>
    %21 = tpu.memref_squeeze %20 : memref<1x128xf32, #tpu.memory_space<vmem>> -> memref<128xf32, #tpu.memory_space<vmem>>
    tpu.enqueue_dma source(%19 : memref<128xf32, #tpu.memory_space<any>>) target(%21 : memref<128xf32, #tpu.memory_space<vmem>>) target_semaphore(%arg5 : memref<!tpu.dma_semaphore, #tpu.memory_space<semaphore_mem>>)
    %c8_i32_11 = arith.constant 8 : i32
    %22 = arith.muli %arg0, %c8_i32_11 : i32
    %c2_i32 = arith.constant 2 : i32
    %23 = arith.addi %22, %c2_i32 : i32
    %c5_i32_12 = arith.constant 5 : i32
    %24 = arith.minsi %23, %c5_i32_12 : i32
    %25 = arith.index_cast %24 : i32 to index
    %26 = memref.load %arg1[%25] : memref<6xi32, #tpu.memory_space<smem>>
    %c0_i32_13 = arith.constant 0 : i32
    %c63_i32_14 = arith.constant 63 : i32
    %27 = arith.maxsi %c0_i32_13, %26 : i32
    %28 = arith.minsi %c63_i32_14, %27 : i32
    %c2_i32_15 = arith.constant 2 : i32
    %c0_i32_16 = arith.constant 0 : i32
    %29 = tpu.memref_slice %arg2[%28, %c0_i32_16] : memref<64x128xf32, #tpu.memory_space<any>> -> memref<1x128xf32, #tpu.memory_space<any>>
    %30 = tpu.memref_squeeze %29 : memref<1x128xf32, #tpu.memory_space<any>> -> memref<128xf32, #tpu.memory_space<any>>
    %c0_i32_17 = arith.constant 0 : i32
    %31 = tpu.memref_slice %arg4[%c2_i32_15, %c0_i32_17] : memref<8x128xf32, #tpu.memory_space<vmem>> -> memref<1x128xf32, #tpu.memory_space<vmem>>
    %32 = tpu.memref_squeeze %31 : memref<1x128xf32, #tpu.memory_space<vmem>> -> memref<128xf32, #tpu.memory_space<vmem>>
    tpu.enqueue_dma source(%30 : memref<128xf32, #tpu.memory_space<any>>) target(%32 : memref<128xf32, #tpu.memory_space<vmem>>) target_semaphore(%arg5 : memref<!tpu.dma_semaphore, #tpu.memory_space<semaphore_mem>>)
    %c8_i32_18 = arith.constant 8 : i32
    %33 = arith.muli %arg0, %c8_i32_18 : i32
    %c3_i32 = arith.constant 3 : i32
    %34 = arith.addi %33, %c3_i32 : i32
    %c5_i32_19 = arith.constant 5 : i32
    %35 = arith.minsi %34, %c5_i32_19 : i32
    %36 = arith.index_cast %35 : i32 to index
    %37 = memref.load %arg1[%36] : memref<6xi32, #tpu.memory_space<smem>>
    %c0_i32_20 = arith.constant 0 : i32
    %c63_i32_21 = arith.constant 63 : i32
    %38 = arith.maxsi %c0_i32_20, %37 : i32
    %39 = arith.minsi %c63_i32_21, %38 : i32
    %c3_i32_22 = arith.constant 3 : i32
    %c0_i32_23 = arith.constant 0 : i32
    %40 = tpu.memref_slice %arg2[%39, %c0_i32_23] : memref<64x128xf32, #tpu.memory_space<any>> -> memref<1x128xf32, #tpu.memory_space<any>>
    %41 = tpu.memref_squeeze %40 : memref<1x128xf32, #tpu.memory_space<any>> -> memref<128xf32, #tpu.memory_space<any>>
    %c0_i32_24 = arith.constant 0 : i32
    %42 = tpu.memref_slice %arg4[%c3_i32_22, %c0_i32_24] : memref<8x128xf32, #tpu.memory_space<vmem>> -> memref<1x128xf32, #tpu.memory_space<vmem>>
    %43 = tpu.memref_squeeze %42 : memref<1x128xf32, #tpu.memory_space<vmem>> -> memref<128xf32, #tpu.memory_space<vmem>>
    tpu.enqueue_dma source(%41 : memref<128xf32, #tpu.memory_space<any>>) target(%43 : memref<128xf32, #tpu.memory_space<vmem>>) target_semaphore(%arg5 : memref<!tpu.dma_semaphore, #tpu.memory_space<semaphore_mem>>)
    %c8_i32_25 = arith.constant 8 : i32
    %44 = arith.muli %arg0, %c8_i32_25 : i32
    %c4_i32 = arith.constant 4 : i32
    %45 = arith.addi %44, %c4_i32 : i32
    %c5_i32_26 = arith.constant 5 : i32
    %46 = arith.minsi %45, %c5_i32_26 : i32
    %47 = arith.index_cast %46 : i32 to index
    %48 = memref.load %arg1[%47] : memref<6xi32, #tpu.memory_space<smem>>
    %c0_i32_27 = arith.constant 0 : i32
    %c63_i32_28 = arith.constant 63 : i32
    %49 = arith.maxsi %c0_i32_27, %48 : i32
    %50 = arith.minsi %c63_i32_28, %49 : i32
    %c4_i32_29 = arith.constant 4 : i32
    %c0_i32_30 = arith.constant 0 : i32
    %51 = tpu.memref_slice %arg2[%50, %c0_i32_30] : memref<64x128xf32, #tpu.memory_space<any>> -> memref<1x128xf32, #tpu.memory_space<any>>
    %52 = tpu.memref_squeeze %51 : memref<1x128xf32, #tpu.memory_space<any>> -> memref<128xf32, #tpu.memory_space<any>>
    %c0_i32_31 = arith.constant 0 : i32
    %53 = tpu.memref_slice %arg4[%c4_i32_29, %c0_i32_31] : memref<8x128xf32, #tpu.memory_space<vmem>> -> memref<1x128xf32, #tpu.memory_space<vmem>>
    %54 = tpu.memref_squeeze %53 : memref<1x128xf32, #tpu.memory_space<vmem>> -> memref<128xf32, #tpu.memory_space<vmem>>
    tpu.enqueue_dma source(%52 : memref<128xf32, #tpu.memory_space<any>>) target(%54 : memref<128xf32, #tpu.memory_space<vmem>>) target_semaphore(%arg5 : memref<!tpu.dma_semaphore, #tpu.memory_space<semaphore_mem>>)
    %c8_i32_32 = arith.constant 8 : i32
    %55 = arith.muli %arg0, %c8_i32_32 : i32
    %c5_i32_33 = arith.constant 5 : i32
    %56 = arith.addi %55, %c5_i32_33 : i32
    %c5_i32_34 = arith.constant 5 : i32
    %57 = arith.minsi %56, %c5_i32_34 : i32
    %58 = arith.index_cast %57 : i32 to index
    %59 = memref.load %arg1[%58] : memref<6xi32, #tpu.memory_space<smem>>
    %c0_i32_35 = arith.constant 0 : i32
    %c63_i32_36 = arith.constant 63 : i32
    %60 = arith.maxsi %c0_i32_35, %59 : i32
    %61 = arith.minsi %c63_i32_36, %60 : i32
    %c5_i32_37 = arith.constant 5 : i32
    %c0_i32_38 = arith.constant 0 : i32
    %62 = tpu.memref_slice %arg2[%61, %c0_i32_38] : memref<64x128xf32, #tpu.memory_space<any>> -> memref<1x128xf32, #tpu.memory_space<any>>
    %63 = tpu.memref_squeeze %62 : memref<1x128xf32, #tpu.memory_space<any>> -> memref<128xf32, #tpu.memory_space<any>>
    %c0_i32_39 = arith.constant 0 : i32
    %64 = tpu.memref_slice %arg4[%c5_i32_37, %c0_i32_39] : memref<8x128xf32, #tpu.memory_space<vmem>> -> memref<1x128xf32, #tpu.memory_space<vmem>>
    %65 = tpu.memref_squeeze %64 : memref<1x128xf32, #tpu.memory_space<vmem>> -> memref<128xf32, #tpu.memory_space<vmem>>
    tpu.enqueue_dma source(%63 : memref<128xf32, #tpu.memory_space<any>>) target(%65 : memref<128xf32, #tpu.memory_space<vmem>>) target_semaphore(%arg5 : memref<!tpu.dma_semaphore, #tpu.memory_space<semaphore_mem>>)
    %c8_i32_40 = arith.constant 8 : i32
    %66 = arith.muli %arg0, %c8_i32_40 : i32
    %c6_i32 = arith.constant 6 : i32
    %67 = arith.addi %66, %c6_i32 : i32
    %c5_i32_41 = arith.constant 5 : i32
    %68 = arith.minsi %67, %c5_i32_41 : i32
    %69 = arith.index_cast %68 : i32 to index
    %70 = memref.load %arg1[%69] : memref<6xi32, #tpu.memory_space<smem>>
    %c0_i32_42 = arith.constant 0 : i32
    %c63_i32_43 = arith.constant 63 : i32
    %71 = arith.maxsi %c0_i32_42, %70 : i32
    %72 = arith.minsi %c63_i32_43, %71 : i32
    %c6_i32_44 = arith.constant 6 : i32
    %c0_i32_45 = arith.constant 0 : i32
    %73 = tpu.memref_slice %arg2[%72, %c0_i32_45] : memref<64x128xf32, #tpu.memory_space<any>> -> memref<1x128xf32, #tpu.memory_space<any>>
    %74 = tpu.memref_squeeze %73 : memref<1x128xf32, #tpu.memory_space<any>> -> memref<128xf32, #tpu.memory_space<any>>
    %c0_i32_46 = arith.constant 0 : i32
    %75 = tpu.memref_slice %arg4[%c6_i32_44, %c0_i32_46] : memref<8x128xf32, #tpu.memory_space<vmem>> -> memref<1x128xf32, #tpu.memory_space<vmem>>
    %76 = tpu.memref_squeeze %75 : memref<1x128xf32, #tpu.memory_space<vmem>> -> memref<128xf32, #tpu.memory_space<vmem>>
    tpu.enqueue_dma source(%74 : memref<128xf32, #tpu.memory_space<any>>) target(%76 : memref<128xf32, #tpu.memory_space<vmem>>) target_semaphore(%arg5 : memref<!tpu.dma_semaphore, #tpu.memory_space<semaphore_mem>>)
    %c8_i32_47 = arith.constant 8 : i32
    %77 = arith.muli %arg0, %c8_i32_47 : i32
    %c7_i32 = arith.constant 7 : i32
    %78 = arith.addi %77, %c7_i32 : i32
    %c5_i32_48 = arith.constant 5 : i32
    %79 = arith.minsi %78, %c5_i32_48 : i32
    %80 = arith.index_cast %79 : i32 to index
    %81 = memref.load %arg1[%80] : memref<6xi32, #tpu.memory_space<smem>>
    %c0_i32_49 = arith.constant 0 : i32
    %c63_i32_50 = arith.constant 63 : i32
    %82 = arith.maxsi %c0_i32_49, %81 : i32
    %83 = arith.minsi %c63_i32_50, %82 : i32
    %c7_i32_51 = arith.constant 7 : i32
    %c0_i32_52 = arith.constant 0 : i32
    %84 = tpu.memref_slice %arg2[%83, %c0_i32_52] : memref<64x128xf32, #tpu.memory_space<any>> -> memref<1x128xf32, #tpu.memory_space<any>>
    %85 = tpu.memref_squeeze %84 : memref<1x128xf32, #tpu.memory_space<any>> -> memref<128xf32, #tpu.memory_space<any>>
    %c0_i32_53 = arith.constant 0 : i32
    %86 = tpu.memref_slice %arg4[%c7_i32_51, %c0_i32_53] : memref<8x128xf32, #tpu.memory_space<vmem>> -> memref<1x128xf32, #tpu.memory_space<vmem>>
    %87 = tpu.memref_squeeze %86 : memref<1x128xf32, #tpu.memory_space<vmem>> -> memref<128xf32, #tpu.memory_space<vmem>>
    tpu.enqueue_dma source(%85 : memref<128xf32, #tpu.memory_space<any>>) target(%87 : memref<128xf32, #tpu.memory_space<vmem>>) target_semaphore(%arg5 : memref<!tpu.dma_semaphore, #tpu.memory_space<semaphore_mem>>)
    %c0_i32_54 = arith.constant 0 : i32
    %c0_i32_55 = arith.constant 0 : i32
    %88 = tpu.memref_slice %arg2[%6, %c0_i32_55] : memref<64x128xf32, #tpu.memory_space<any>> -> memref<1x128xf32, #tpu.memory_space<any>>
    %89 = tpu.memref_squeeze %88 : memref<1x128xf32, #tpu.memory_space<any>> -> memref<128xf32, #tpu.memory_space<any>>
    %c0_i32_56 = arith.constant 0 : i32
    %90 = tpu.memref_slice %arg4[%c0_i32_54, %c0_i32_56] : memref<8x128xf32, #tpu.memory_space<vmem>> -> memref<1x128xf32, #tpu.memory_space<vmem>>
    %91 = tpu.memref_squeeze %90 : memref<1x128xf32, #tpu.memory_space<vmem>> -> memref<128xf32, #tpu.memory_space<vmem>>
    tpu.wait_dma2 semaphore(%arg5 : memref<!tpu.dma_semaphore, #tpu.memory_space<semaphore_mem>>) src(%89 : memref<128xf32, #tpu.memory_space<any>>) dst(%91 : memref<128xf32, #tpu.memory_space<vmem>>)
    %c1_i32_57 = arith.constant 1 : i32
    %c0_i32_58 = arith.constant 0 : i32
    %92 = tpu.memref_slice %arg2[%17, %c0_i32_58] : memref<64x128xf32, #tpu.memory_space<any>> -> memref<1x128xf32, #tpu.memory_space<any>>
    %93 = tpu.memref_squeeze %92 : memref<1x128xf32, #tpu.memory_space<any>> -> memref<128xf32, #tpu.memory_space<any>>
    %c0_i32_59 = arith.constant 0 : i32
    %94 = tpu.memref_slice %arg4[%c1_i32_57, %c0_i32_59] : memref<8x128xf32, #tpu.memory_space<vmem>> -> memref<1x128xf32, #tpu.memory_space<vmem>>
    %95 = tpu.memref_squeeze %94 : memref<1x128xf32, #tpu.memory_space<vmem>> -> memref<128xf32, #tpu.memory_space<vmem>>
    tpu.wait_dma2 semaphore(%arg5 : memref<!tpu.dma_semaphore, #tpu.memory_space<semaphore_mem>>) src(%93 : memref<128xf32, #tpu.memory_space<any>>) dst(%95 : memref<128xf32, #tpu.memory_space<vmem>>)
    %c2_i32_60 = arith.constant 2 : i32
    %c0_i32_61 = arith.constant 0 : i32
    %96 = tpu.memref_slice %arg2[%28, %c0_i32_61] : memref<64x128xf32, #tpu.memory_space<any>> -> memref<1x128xf32, #tpu.memory_space<any>>
    %97 = tpu.memref_squeeze %96 : memref<1x128xf32, #tpu.memory_space<any>> -> memref<128xf32, #tpu.memory_space<any>>
    %c0_i32_62 = arith.constant 0 : i32
    %98 = tpu.memref_slice %arg4[%c2_i32_60, %c0_i32_62] : memref<8x128xf32, #tpu.memory_space<vmem>> -> memref<1x128xf32, #tpu.memory_space<vmem>>
    %99 = tpu.memref_squeeze %98 : memref<1x128xf32, #tpu.memory_space<vmem>> -> memref<128xf32, #tpu.memory_space<vmem>>
    tpu.wait_dma2 semaphore(%arg5 : memref<!tpu.dma_semaphore, #tpu.memory_space<semaphore_mem>>) src(%97 : memref<128xf32, #tpu.memory_space<any>>) dst(%99 : memref<128xf32, #tpu.memory_space<vmem>>)
    %c3_i32_63 = arith.constant 3 : i32
    %c0_i32_64 = arith.constant 0 : i32
    %100 = tpu.memref_slice %arg2[%39, %c0_i32_64] : memref<64x128xf32, #tpu.memory_space<any>> -> memref<1x128xf32, #tpu.memory_space<any>>
    %101 = tpu.memref_squeeze %100 : memref<1x128xf32, #tpu.memory_space<any>> -> memref<128xf32, #tpu.memory_space<any>>
    %c0_i32_65 = arith.constant 0 : i32
    %102 = tpu.memref_slice %arg4[%c3_i32_63, %c0_i32_65] : memref<8x128xf32, #tpu.memory_space<vmem>> -> memref<1x128xf32, #tpu.memory_space<vmem>>
    %103 = tpu.memref_squeeze %102 : memref<1x128xf32, #tpu.memory_space<vmem>> -> memref<128xf32, #tpu.memory_space<vmem>>
    tpu.wait_dma2 semaphore(%arg5 : memref<!tpu.dma_semaphore, #tpu.memory_space<semaphore_mem>>) src(%101 : memref<128xf32, #tpu.memory_space<any>>) dst(%103 : memref<128xf32, #tpu.memory_space<vmem>>)
    %c4_i32_66 = arith.constant 4 : i32
    %c0_i32_67 = arith.constant 0 : i32
    %104 = tpu.memref_slice %arg2[%50, %c0_i32_67] : memref<64x128xf32, #tpu.memory_space<any>> -> memref<1x128xf32, #tpu.memory_space<any>>
    %105 = tpu.memref_squeeze %104 : memref<1x128xf32, #tpu.memory_space<any>> -> memref<128xf32, #tpu.memory_space<any>>
    %c0_i32_68 = arith.constant 0 : i32
    %106 = tpu.memref_slice %arg4[%c4_i32_66, %c0_i32_68] : memref<8x128xf32, #tpu.memory_space<vmem>> -> memref<1x128xf32, #tpu.memory_space<vmem>>
    %107 = tpu.memref_squeeze %106 : memref<1x128xf32, #tpu.memory_space<vmem>> -> memref<128xf32, #tpu.memory_space<vmem>>
    tpu.wait_dma2 semaphore(%arg5 : memref<!tpu.dma_semaphore, #tpu.memory_space<semaphore_mem>>) src(%105 : memref<128xf32, #tpu.memory_space<any>>) dst(%107 : memref<128xf32, #tpu.memory_space<vmem>>)
    %c5_i32_69 = arith.constant 5 : i32
    %c0_i32_70 = arith.constant 0 : i32
    %108 = tpu.memref_slice %arg2[%61, %c0_i32_70] : memref<64x128xf32, #tpu.memory_space<any>> -> memref<1x128xf32, #tpu.memory_space<any>>
    %109 = tpu.memref_squeeze %108 : memref<1x128xf32, #tpu.memory_space<any>> -> memref<128xf32, #tpu.memory_space<any>>
    %c0_i32_71 = arith.constant 0 : i32
    %110 = tpu.memref_slice %arg4[%c5_i32_69, %c0_i32_71] : memref<8x128xf32, #tpu.memory_space<vmem>> -> memref<1x128xf32, #tpu.memory_space<vmem>>
    %111 = tpu.memref_squeeze %110 : memref<1x128xf32, #tpu.memory_space<vmem>> -> memref<128xf32, #tpu.memory_space<vmem>>
    tpu.wait_dma2 semaphore(%arg5 : memref<!tpu.dma_semaphore, #tpu.memory_space<semaphore_mem>>) src(%109 : memref<128xf32, #tpu.memory_space<any>>) dst(%111 : memref<128xf32, #tpu.memory_space<vmem>>)
    %c6_i32_72 = arith.constant 6 : i32
    %c0_i32_73 = arith.constant 0 : i32
    %112 = tpu.memref_slice %arg2[%72, %c0_i32_73] : memref<64x128xf32, #tpu.memory_space<any>> -> memref<1x128xf32, #tpu.memory_space<any>>
    %113 = tpu.memref_squeeze %112 : memref<1x128xf32, #tpu.memory_space<any>> -> memref<128xf32, #tpu.memory_space<any>>
    %c0_i32_74 = arith.constant 0 : i32
    %114 = tpu.memref_slice %arg4[%c6_i32_72, %c0_i32_74] : memref<8x128xf32, #tpu.memory_space<vmem>> -> memref<1x128xf32, #tpu.memory_space<vmem>>
    %115 = tpu.memref_squeeze %114 : memref<1x128xf32, #tpu.memory_space<vmem>> -> memref<128xf32, #tpu.memory_space<vmem>>
    tpu.wait_dma2 semaphore(%arg5 : memref<!tpu.dma_semaphore, #tpu.memory_space<semaphore_mem>>) src(%113 : memref<128xf32, #tpu.memory_space<any>>) dst(%115 : memref<128xf32, #tpu.memory_space<vmem>>)
    %c7_i32_75 = arith.constant 7 : i32
    %c0_i32_76 = arith.constant 0 : i32
    %116 = tpu.memref_slice %arg2[%83, %c0_i32_76] : memref<64x128xf32, #tpu.memory_space<any>> -> memref<1x128xf32, #tpu.memory_space<any>>
    %117 = tpu.memref_squeeze %116 : memref<1x128xf32, #tpu.memory_space<any>> -> memref<128xf32, #tpu.memory_space<any>>
    %c0_i32_77 = arith.constant 0 : i32
    %118 = tpu.memref_slice %arg4[%c7_i32_75, %c0_i32_77] : memref<8x128xf32, #tpu.memory_space<vmem>> -> memref<1x128xf32, #tpu.memory_space<vmem>>
    %119 = tpu.memref_squeeze %118 : memref<1x128xf32, #tpu.memory_space<vmem>> -> memref<128xf32, #tpu.memory_space<vmem>>
    tpu.wait_dma2 semaphore(%arg5 : memref<!tpu.dma_semaphore, #tpu.memory_space<semaphore_mem>>) src(%117 : memref<128xf32, #tpu.memory_space<any>>) dst(%119 : memref<128xf32, #tpu.memory_space<vmem>>)
    %c0 = arith.constant 0 : index
    %c0_78 = arith.constant 0 : index
    %120 = vector.load %arg4[%c0, %c0_78] : memref<8x128xf32, #tpu.memory_space<vmem>>, vector<8x128xf32>
    %c0_79 = arith.constant 0 : index
    %c0_80 = arith.constant 0 : index
    %121 = vector.load %arg3[%c0_79, %c0_80] : memref<8x128xf32, #tpu.memory_space<vmem>>, vector<8x128xf32>
    tpu.vector_store %arg3[%c0_79, %c0_80], %120 {strides = array<i32>} : memref<8x128xf32, #tpu.memory_space<vmem>>, vector<8x128xf32>,
    return
  }
  func.func @transform_1(%arg0: i32, %arg1: memref<6xi32, #tpu.memory_space<smem>>) -> (i32, i32) {
    %c0_i32 = arith.constant 0 : i32
    %c0_i32_0 = arith.constant 0 : i32
    return %arg0, %c0_i32 : i32, i32
  }
}

</mosaic_0001>

<bundles_post_ra>
// kernel: tpu_custom_call.1
= control target key start
LH: loop header
LB: loop body
LE: loop exit
PB: predicated region body
PF: predicated region fallthrough
CT: control target
= control target key end

     0   :  { %s555_s12 = smov [#allocation5]   ;;  %s664_s0 = inlined_call_operand.hbm [shape: s32[6], index: 0, kind: input, shape index: {}]   ;;  %s665_s1 = inlined_call_operand.hbm [shape: f32[64,128], index: 1, kind: input, shape index: {}]   ;;  %s666_s2 = inlined_call_operand.hbm [shape: f32[6,128], index: 2, kind: output, shape index: {}]  }
   0x1   :  { %s8_s11 = sshll.u32 %s664_s0, 4  ;;  %s9_s11 = int_to_ptr.hbm [resolvable:$true] %s8_s11 }
   0x2   :  { %11 = dma.hbm_to_smem %s9_s11, 16, %s555_s12, [#allocation4] }
   0x3   :  { %549 = dma.done.wait [#allocation4], 16 }
   0x4   :  { %550 = vsyncadd [#allocation4], 4294967280 }
   0x5   :  { %14 = sfence }
   0x6   :  { %15 = vsyncpa [#allocation7], 0  ;;  %s19_s13 = sld [smem:[#allocation5]]  ;;  %s556_s14 = smov [#allocation2]  }
   0x7   :  { %s583_s15 = sshll.u32 %s556_s14, 4  ;;  %s252_s16 = sld [smem:[#allocation5 + $0x1]]  ;;  %s35_s15 = int_to_ptr.vmem [resolvable:$true] %s583_s15 }
   0x8   :  { %s557_s17 = smov [#allocation2 + $0x1]   ;;  %s588_s19 = sld [smem:[#allocation5 + $0x2]] }
   0x9   :  { %s586_s18 = sshll.u32 %s557_s17, 4  ;;  %s558_s0 = smov [#allocation2 + $0x2]   ;;  %s58_s18 = int_to_ptr.vmem [resolvable:$true] %s586_s18 }
   0xa   :  { %s591_s20 = sshll.u32 %s558_s0, 4  ;;  %s593_s21 = sld [smem:[#allocation5 + $0x3]]  ;;  %s81_s20 = int_to_ptr.vmem [resolvable:$true] %s591_s20 }
   0xb   :  { %s605_s6 = scalar_lea.hbm %s665_s1, 64 }
   0xc   :  { %p20_p0 = scmp.gt.s32.totalorder %s19_s13, 0  ;;  %p247_p1 = scmp.lt.s32.totalorder %s19_s13, 63 }
   0xd   :  { %p42_p2 = scmp.gt.s32.totalorder %s252_s16, 0  ;;  %p253_p3 = scmp.lt.s32.totalorder %s252_s16, 63 }
   0xe   :  { %s668_s13 = smov (!%p20_p0, %s19_s13), 0  ;;  %p65_p4 = scmp.gt.s32.totalorder %s588_s19, 0 }
   0xf   :  { %s670_s16 = smov (!%p42_p2, %s252_s16), 0  ;;  %s672_s13 = smov (!%p247_p1, %s668_s13), 63 }
  0x10   :  { %s674_s16 = smov (!%p253_p3, %s670_s16), 63  ;;  %s24_s24 = scalar_lea.hbm %s665_s1, %s672_s13 }
  0x11   :  { %s32_s25 = sshll.u32 %s24_s24, 4  ;;  %s46_s28 = scalar_lea.hbm %s665_s1, %s674_s16  ;;  %s33_s25 = int_to_ptr.hbm [resolvable:$true] %s32_s25 }
  0x12   :  { %s55_s29 = sshll.u32 %s46_s28, 4  ;;  %s333_s30 = sshra.s32 %s33_s25, 4  ;;  %s334_s30 = int_to_ptr.hbm [resolvable:$true] %s333_s30  ;;  %s56_s29 = int_to_ptr.hbm [resolvable:$true] %s55_s29 }
  0x13   :  { %s335_s3 = scalar_lea.hbm %s334_s30, 1  ;;  %p338_p6 = scmp.lt.s32.totalorder %s334_s30, %s665_s1 }
  0x14   :  { %p336_p5 = scmp.ne.s32.totalorder %s334_s30, %s335_s3  ;;  %p339_p7 = scmp.lt.s32.totalorder %s605_s6, %s335_s3 }
  0x16   :  { %p340_p8 = por %p339_p7, %p338_p6 }
  0x18   :  { %p341_p9 = pnand %p340_p8, %p336_p5 }
  0x1a   :  { %344 = shalt.err (!%p341_p9)  }
  0x1b   :  { %37 = dma.hbm_to_vmem [thread:$0]  %s33_s25, 16, %s35_s15, [#allocation3] }
  0x1c   :  { %p259_p10 = scmp.lt.s32.totalorder %s588_s19, 63  ;;  %s357_s9 = sshra.s32 %s56_s29, 4  ;;  %s358_s9 = int_to_ptr.hbm [resolvable:$true] %s357_s9 }
  0x1d   :  { %s359_s10 = scalar_lea.hbm %s358_s9, 1  ;;  %p362_p12 = scmp.lt.s32.totalorder %s358_s9, %s665_s1 }
  0x1e   :  { %p360_p11 = scmp.ne.s32.totalorder %s358_s9, %s359_s10  ;;  %p363_p13 = scmp.lt.s32.totalorder %s605_s6, %s359_s10 }
  0x20   :  { %p364_p0 = por %p363_p13, %p362_p12 }
  0x22   :  { %p365_p1 = pnand %p364_p0, %p360_p11 }
  0x24   :  { %368 = shalt.err (!%p365_p1)  }
  0x25   :  { %60 = dma.hbm_to_vmem [thread:$0]  %s56_s29, 16, %s58_s18, [#allocation3] }
  0x26   :  { %s66_s13 = scalar_select %p65_p4, %s588_s19, 0 }
  0x27   :  { %p88_p2 = scmp.gt.s32.totalorder %s593_s21, 0  ;;  %p265_p3 = scmp.lt.s32.totalorder %s593_s21, 63 }
  0x28   :  { %s676_s13 = smov (!%p259_p10, %s66_s13), 63  ;;  %s559_s22 = smov [#allocation2 + $0x3]  }
  0x29   :  { %s89_s14 = scalar_select %p88_p2, %s593_s21, 0 }
  0x2a   :  { %s69_s17 = scalar_lea.hbm %s665_s1, %s676_s13  ;;  %s103_s23 = sshll.u32 %s559_s22, 4  ;;  %s104_s23 = int_to_ptr.vmem [resolvable:$true] %s103_s23 }
  0x2b   :  { %s78_s0 = sshll.u32 %s69_s17, 4  ;;  %s79_s0 = int_to_ptr.hbm [resolvable:$true] %s78_s0 }
  0x2c   :  { %s381_s24 = sshra.s32 %s79_s0, 4  ;;  %s382_s24 = int_to_ptr.hbm [resolvable:$true] %s381_s24 }
  0x2d   :  { %s383_s18 = scalar_lea.hbm %s382_s24, 1  ;;  %p386_p4 = scmp.lt.s32.totalorder %s382_s24, %s665_s1 }
  0x2e   :  { %p384_p5 = scmp.ne.s32.totalorder %s382_s24, %s383_s18  ;;  %p387_p6 = scmp.lt.s32.totalorder %s605_s6, %s383_s18 }
  0x30   :  { %p388_p7 = por %p387_p6, %p386_p4 }
  0x32   :  { %p389_p8 = pnand %p388_p7, %p384_p5 }
  0x34   :  { %392 = shalt.err (!%p389_p8)  }
  0x35   :  { %83 = dma.hbm_to_vmem [thread:$0]  %s79_s0, 16, %s81_s20, [#allocation3] }
  0x36   :  { %s678_s14 = smov (!%p265_p3, %s89_s14), 63  ;;  %s270_s19 = sld [smem:[#allocation5 + $0x4]] }
  0x37   :  { %s92_s29 = scalar_lea.hbm %s665_s1, %s678_s14 }
  0x38   :  { %s101_s30 = sshll.u32 %s92_s29, 4  ;;  %s102_s30 = int_to_ptr.hbm [resolvable:$true] %s101_s30 }
  0x39   :  { %s405_s3 = sshra.s32 %s102_s30, 4  ;;  %s406_s3 = int_to_ptr.hbm [resolvable:$true] %s405_s3 }
  0x3a   :  { %s407_s4 = scalar_lea.hbm %s406_s3, 1  ;;  %p410_p10 = scmp.lt.s32.totalorder %s406_s3, %s665_s1 }
  0x3b   :  { %p408_p9 = scmp.ne.s32.totalorder %s406_s3, %s407_s4  ;;  %p411_p11 = scmp.lt.s32.totalorder %s605_s6, %s407_s4 }
  0x3d   :  { %p412_p12 = por %p411_p11, %p410_p10 }
  0x3f   :  { %p413_p13 = pnand %p412_p12, %p408_p9 }
  0x41   :  { %416 = shalt.err (!%p413_p13)  }
  0x42   :  { %106 = dma.hbm_to_vmem [thread:$0]  %s102_s30, 16, %s104_s23, [#allocation3] }
  0x43   :  { %s560_s20 = smov [#allocation2 + $0x4]   ;;  %s276_s8 = sld [smem:[#allocation5 + $0x5]] }
  0x44   :  { %s126_s21 = sshll.u32 %s560_s20, 4  ;;  %p111_p0 = scmp.gt.s32.totalorder %s270_s19, 0  ;;  %s127_s21 = int_to_ptr.vmem [resolvable:$true] %s126_s21 }
  0x45   :  { %p271_p1 = scmp.lt.s32.totalorder %s270_s19, 63 }
  0x46   :  { %s680_s19 = smov (!%p111_p0, %s270_s19), 0 }
  0x47   :  { %s682_s19 = smov (!%p271_p1, %s680_s19), 63 }
  0x48   :  { %s115_s11 = scalar_lea.hbm %s665_s1, %s682_s19 }
  0x49   :  { %p134_p2 = scmp.gt.s32.totalorder %s276_s8, 0  ;;  %s124_s12 = sshll.u32 %s115_s11, 4  ;;  %s125_s12 = int_to_ptr.hbm [resolvable:$true] %s124_s12 }
  0x4a   :  { %p277_p3 = scmp.lt.s32.totalorder %s276_s8, 63  ;;  %s429_s13 = sshra.s32 %s125_s12, 4  ;;  %s430_s13 = int_to_ptr.hbm [resolvable:$true] %s429_s13 }
  0x4b   :  { %s431_s14 = scalar_lea.hbm %s430_s13, 1  ;;  %p434_p4 = scmp.lt.s32.totalorder %s430_s13, %s665_s1 }
  0x4c   :  { %p432_p5 = scmp.ne.s32.totalorder %s430_s13, %s431_s14  ;;  %p435_p6 = scmp.lt.s32.totalorder %s605_s6, %s431_s14 }
  0x4e   :  { %p436_p7 = por %p435_p6, %p434_p4 }
  0x50   :  { %p437_p8 = pnand %p436_p7, %p432_p5 }
  0x52   :  { %440 = shalt.err (!%p437_p8)  }
  0x53   :  { %129 = dma.hbm_to_vmem [thread:$0]  %s125_s12, 16, %s127_s21, [#allocation3] }
  0x54   :  { %s135_s17 = scalar_select %p134_p2, %s276_s8, 0 }
  0x55   :  { %s561_s0 = smov [#allocation2 + $0x5]   ;;  %s562_s23 = smov [#allocation2 + $0x6]  }
  0x56   :  { %s149_s22 = sshll.u32 %s561_s0, 4  ;;  %s172_s24 = sshll.u32 %s562_s23, 4  ;;  %s150_s22 = int_to_ptr.vmem [resolvable:$true] %s149_s22  ;;  %s173_s24 = int_to_ptr.vmem [resolvable:$true] %s172_s24 }
  0x57   :  { %s684_s17 = smov (!%p277_p3, %s135_s17), 63  ;;  %s563_s18 = smov [#allocation2 + $0x7]  }
  0x58   :  { %s195_s25 = sshll.u32 %s563_s18, 4  ;;  %s138_s27 = scalar_lea.hbm %s665_s1, %s684_s17  ;;  %s196_s25 = int_to_ptr.vmem [resolvable:$true] %s195_s25 }
  0x59   :  { %s147_s28 = sshll.u32 %s138_s27, 4  ;;  %s148_s28 = int_to_ptr.hbm [resolvable:$true] %s147_s28 }
  0x5a   :  { %s453_s29 = sshra.s32 %s148_s28, 4  ;;  %s454_s29 = int_to_ptr.hbm [resolvable:$true] %s453_s29 }
  0x5b   :  { %s455_s30 = scalar_lea.hbm %s454_s29, 1  ;;  %p458_p10 = scmp.lt.s32.totalorder %s454_s29, %s665_s1 }
  0x5c   :  { %p456_p9 = scmp.ne.s32.totalorder %s454_s29, %s455_s30  ;;  %p459_p11 = scmp.lt.s32.totalorder %s605_s6, %s455_s30 }
  0x5e   :  { %p460_p12 = por %p459_p11, %p458_p10 }
  0x60   :  { %p461_p13 = pnand %p460_p12, %p456_p9 }
  0x62   :  { %464 = shalt.err (!%p461_p13)  }
  0x63   :  { %152 = dma.hbm_to_vmem [thread:$0]  %s148_s28, 16, %s150_s22, [#allocation3] }
  0x64   :  { %488 = shalt.err (!%p461_p13)  }
  0x65   :  { %175 = dma.hbm_to_vmem [thread:$0]  %s148_s28, 16, %s173_s24, [#allocation3] }
  0x66   :  { %512 = shalt.err (!%p461_p13)  }
  0x67   :  { %198 = dma.hbm_to_vmem [thread:$0]  %s148_s28, 16, %s196_s25, [#allocation3] }
  0x68   :  { %551 = dma.done.wait [#allocation3], 128 }
  0x69   :  { %552 = vsyncadd [#allocation3], 4294967168  ;;  %s564_s5 = smov [#allocation6]   ;;  %s224_s8 = sshll.u32 %s666_s2, 4  ;;  %v215_v0 = vld [vmem:[#allocation2] sm:$0xff]  ;;  %s225_s8 = int_to_ptr.hbm [resolvable:$true] %s224_s8 }
  0x6a   :  { %s222_s7 = sshll.u32 %s564_s5, 4  ;;  %216 = vst [vmem:[#allocation6] sm:$0xff] %v215_v0  ;;  %s223_s7 = int_to_ptr.vmem [resolvable:$true] %s222_s7 }
  0x6b   :  { %227 = dma.vmem_to_hbm [thread:$0]  %s223_s7, 128, %s225_s8, [#allocation7]  }
  0x6c   :  { %553 = dma.done.wait [#allocation7], 128  }
  0x6d   :  { %554 = vsyncadd [#allocation7], 4294967168 }
  0x6e   :  { %232 = vsyncpa [#allocation7], 1 }
  0x6f   :  { %233 = vsyncmov [#allocation3] }
  0x72   :  { %s234_s1 = vpop.sfrf %233 }
  0x73   :  { %p294_p0 = scmp.ne.s32.totalorder %s234_s1, 0 }
  0x75   :  { %238 = shalt.err (%p294_p0)  }

</bundles_post_ra>
